<compile_context>
chip_gen: v5e
topology: v5e:2x2
jax: 0.10.0
libtpu: 0.0.40
codegen_flags: <defaults>
</compile_context>

<pallas_src>
import functools
import math

import jax
import jax.numpy as jnp
from jax.experimental import pallas as pl
from jax.experimental.pallas import tpu as pltpu


def _round_up(n, m):
    return ((n + m - 1) // m) * m


def _cdiv(a, b):
    return -(-a // b)


def _choose_tiling(batch, tb_max):
    """Pick (tb, b_pad, num_tiles): tb a multiple of 8, ~<= tb_max, minimal padding."""
    b8 = _round_up(batch, 8)
    num_tiles = max(1, _cdiv(b8, tb_max))
    tb = _round_up(_cdiv(b8, num_tiles), 8)
    return tb, tb * num_tiles, num_tiles


def _mlp_av(x, w1_ref, b1_ref, w2_ref, b2_ref, wav_ref, bav_ref):
    """Shared body: two relu layers + fused [A|V] head. Returns (rows, out_dim+1)."""
    h1 = jnp.dot(x, w1_ref[...], preferred_element_type=jnp.float32) + b1_ref[...]
    h1 = jnp.maximum(h1, 0.0)
    h2 = jnp.dot(h1, w2_ref[...], preferred_element_type=jnp.float32) + b2_ref[...]
    h2 = jnp.maximum(h2, 0.0)
    return jnp.dot(h2, wav_ref[...], preferred_element_type=jnp.float32) + bav_ref[...]


def _va_single_tile_kernel(x_ref, w1_ref, b1_ref, w2_ref, b2_ref, wav_ref, bav_ref,
                           q_ref, *, out_dim, batch, need_row_mask):
    """Fused one-pass kernel for batches that fit in a single tile: writes Q directly."""
    av = _mlp_av(x_ref[...], w1_ref, b1_ref, w2_ref, b2_ref, wav_ref, bav_ref)
    a = av[:, :out_dim]
    v = av[:, out_dim:out_dim + 1]
    a_for_sum = a
    if need_row_mask:  # static: only when batch was padded up to a multiple of 8
        row_ids = jax.lax.broadcasted_iota(jnp.int32, a.shape, 0)
        a_for_sum = jnp.where(row_ids < batch, a, 0.0)
    s = jnp.sum(a_for_sum, axis=1, keepdims=True)
    s = jnp.sum(s, axis=0, keepdims=True)                       # (1, 1)
    mean = s * (1.0 / float(batch * out_dim))
    q_ref[...] = v + (a - mean)


def _va_main_kernel(x_ref, w1_ref, b1_ref, w2_ref, b2_ref, wav_ref, bav_ref,
                    av_ref, part_ref, *, tb, out_dim, batch, need_row_mask):
    """Pass 1 (multi-tile): stream compact [A|V] tiles + per-tile partial A-sums."""
    i = pl.program_id(0)
    av = _mlp_av(x_ref[...], w1_ref, b1_ref, w2_ref, b2_ref, wav_ref, bav_ref)
    av_ref[...] = av

    a = av[:, :out_dim]
    if need_row_mask:  # static: only the last tile actually has padded rows
        row_ids = jax.lax.broadcasted_iota(jnp.int32, a.shape, 0) + i * tb
        a = jnp.where(row_ids < batch, a, 0.0)
    s = jnp.sum(a, axis=1, keepdims=True)
    s = jnp.sum(s, axis=0, keepdims=True)                       # (1, 1)
    part_ref[...] = jnp.broadcast_to(s, part_ref.shape)         # splat into (8, 128)


def _va_epilogue_kernel(mean_ref, av_ref, q_ref, *, out_dim):
    """Pass 2: Q = V + (A - mean), streamed, writes the final (tb, out_dim) tile."""
    av = av_ref[...]
    q_ref[...] = av[:, out_dim:out_dim + 1] + (av[:, :out_dim] - mean_ref[...])


def va_net_forward(x, fused_params, *, tb_max=1024):
    """VA_net forward.  `fused_params` = (W1, b1, W2, b2, W_av, b_av) with the
    A/V heads pre-fused once via fuse_va_net_params (hoisted out of the call)."""
    w1, b1, w2, b2, wav, bav = fused_params
    batch, in_dim = x.shape
    hidden = w1.shape[1]
    navc = wav.shape[1]              # out_dim + 1
    out_dim = navc - 1

    tb, b_pad, num_tiles = _choose_tiling(batch, tb_max)
    need_row_mask = b_pad != batch
    x_p = jnp.pad(x, ((0, b_pad - batch), (0, 0))) if need_row_mask else x

    weight_specs = [
        pl.BlockSpec((in_dim, hidden), lambda i: (0, 0)),    # W1   (VMEM-resident)
        pl.BlockSpec((1, hidden), lambda i: (0, 0)),         # b1
        pl.BlockSpec((hidden, hidden), lambda i: (0, 0)),    # W2
        pl.BlockSpec((1, hidden), lambda i: (0, 0)),         # b2
        pl.BlockSpec((hidden, navc), lambda i: (0, 0)),      # [WA | WV]
        pl.BlockSpec((1, navc), lambda i: (0, 0)),           # [bA | bV]
    ]

    if num_tiles == 1:
        # Typical DQN case: one fused pass, Q written directly, no intermediates.
        kernel = functools.partial(_va_single_tile_kernel, out_dim=out_dim,
                                   batch=batch, need_row_mask=need_row_mask)
        q = pl.pallas_call(
            kernel,
            out_shape=jax.ShapeDtypeStruct((b_pad, out_dim), jnp.float32),
            grid_spec=pltpu.PrefetchScalarGridSpec(
                num_scalar_prefetch=0,
                grid=(1,),
                in_specs=[pl.BlockSpec((b_pad, in_dim), lambda i: (0, 0))] + weight_specs,
                out_specs=pl.BlockSpec((b_pad, out_dim), lambda i: (0, 0)),
            ),
            compiler_params=pltpu.CompilerParams(dimension_semantics=("arbitrary",)),
        )(x_p, w1, b1, w2, b2, wav, bav)
        return q[:batch] if need_row_mask else q

    # --- Pass 1: parallel batch grid, streamed [A|V] tiles + per-tile partial sums ---
    kernel = functools.partial(_va_main_kernel, tb=tb, out_dim=out_dim,
                               batch=batch, need_row_mask=need_row_mask)
    av, partials = pl.pallas_call(
        kernel,
        out_shape=(jax.ShapeDtypeStruct((b_pad, navc), jnp.float32),
                   jax.ShapeDtypeStruct((num_tiles * 8, 128), jnp.float32)),
        grid_spec=pltpu.PrefetchScalarGridSpec(
            num_scalar_prefetch=0,
            grid=(num_tiles,),
            in_specs=[pl.BlockSpec((tb, in_dim), lambda i: (i, 0))] + weight_specs,
            out_specs=(pl.BlockSpec((tb, navc), lambda i: (i, 0)),
                       pl.BlockSpec((8, 128), lambda i: (i, 0))),
        ),
        compiler_params=pltpu.CompilerParams(
            dimension_semantics=("parallel",),   # no cross-tile state -> safe on v7x 2-TC
        ),
    )(x_p, w1, b1, w2, b2, wav, bav)

    # Tiny scalar reduction over the per-tile partial sums (one value per tile).
    a_sum = jnp.sum(partials[::8, 0])
    a_mean = (a_sum * (1.0 / float(batch * out_dim))).reshape(1, 1)

    # --- Pass 2: Q = V + (A - mean), writes the final (batch-padded, out_dim) array ---
    q = pl.pallas_call(
        functools.partial(_va_epilogue_kernel, out_dim=out_dim),
        out_shape=jax.ShapeDtypeStruct((b_pad, out_dim), jnp.float32),
        grid_spec=pltpu.PrefetchScalarGridSpec(
            num_scalar_prefetch=0,
            grid=(num_tiles,),
            in_specs=[pl.BlockSpec((1, 1), lambda i: (0, 0)),       # mean (resident)
                      pl.BlockSpec((tb, navc), lambda i: (i, 0))],  # [A|V] (streamed)
            out_specs=pl.BlockSpec((tb, out_dim), lambda i: (i, 0)),
        ),
        compiler_params=pltpu.CompilerParams(dimension_semantics=("parallel",)),
    )(a_mean, av)

    return q[:batch] if need_row_mask else q


def init_va_net_params(key, input_dim, hidden_dim, output_dim):
    """Kaiming-uniform (relu) init, zero biases — same as the PyTorch module.
    Weights stored as (in_features, out_features) = transpose of torch Linear."""
    def kaiming_uniform(k, fan_in, fan_out):
        bound = math.sqrt(6.0 / fan_in)
        return jax.random.uniform(k, (fan_in, fan_out), jnp.float32, -bound, bound)

    k1, k2, k3, k4 = jax.random.split(key, 4)
    w1 = kaiming_uniform(k1, input_dim, hidden_dim)
    b1 = jnp.zeros((1, hidden_dim), jnp.float32)
    w2 = kaiming_uniform(k2, hidden_dim, hidden_dim)
    b2 = jnp.zeros((1, hidden_dim), jnp.float32)
    wa = kaiming_uniform(k3, hidden_dim, output_dim)
    ba = jnp.zeros((1, output_dim), jnp.float32)
    wv = kaiming_uniform(k4, hidden_dim, 1)
    bv = jnp.zeros((1, 1), jnp.float32)
    return (w1, b1, w2, b2, wa, ba, wv, bv)


def fuse_va_net_params(params):
    """One-time (per parameter update) fusion of the A and V heads into a single
    (hidden, out_dim + 1) matmul — hoisted out of the per-call forward."""
    w1, b1, w2, b2, wa, ba, wv, bv = params
    wav = jnp.concatenate([wa, wv], axis=1)
    bav = jnp.concatenate([ba, bv], axis=1)
    return (w1, b1, w2, b2, wav, bav)


def va_net_reference(x, params):
    """Pure-JAX reference (full f32 matmul precision) for correctness checks."""
    w1, b1, w2, b2, wa, ba, wv, bv = params
    hi = jax.lax.Precision.HIGHEST
    h1 = jnp.maximum(jnp.dot(x, w1, precision=hi) + b1, 0.0)
    h2 = jnp.maximum(jnp.dot(h1, w2, precision=hi) + b2, 0.0)
    a = jnp.dot(h2, wa, precision=hi) + ba
    v = jnp.dot(h2, wv, precision=hi) + bv
    return v + (a - jnp.mean(a))


if __name__ == "__main__":
    input_dim, hidden_dim, output_dim = 16, 32, 4

    key = jax.random.PRNGKey(0)
    kx, kp = jax.random.split(key)
    params = init_va_net_params(kp, input_dim, hidden_dim, output_dim)

    # A second parameter set with non-zero biases (same forward) to make the
    # padded rows non-trivial and exercise the row-masking path.
    kb = jax.random.split(kp, 5)
    w1, b1, w2, b2, wa, ba, wv, bv = params
    params_nz = (
        w1, 0.1 * jax.random.normal(kb[1], (1, hidden_dim), jnp.float32),
        w2, 0.1 * jax.random.normal(kb[2], (1, hidden_dim), jnp.float32),
        wa, 0.1 * jax.random.normal(kb[3], (1, output_dim), jnp.float32),
        wv, 0.1 * jax.random.normal(kb[4], (1, 1), jnp.float32),
    )

    # Hoisted weight prep: done once per parameter set, not per forward call.
    fused = fuse_va_net_params(params)
    fused_nz = fuse_va_net_params(params_nz)

    def check(name, x, p_fused, p_raw, **kw):
        q = jax.block_until_ready(va_net_forward(x, p_fused, **kw))
        r = va_net_reference(x, p_raw)
        assert q.shape == r.shape, f"{name}: shape {q.shape} vs {r.shape}"
        assert jnp.allclose(q, r, atol=5e-4, rtol=5e-4), f"{name}: mismatch vs reference"

    # case 1: tiny batch -> fused single-tile path (typical DQN use)
    x1 = jax.random.normal(kx, (8, input_dim), jnp.float32)
    check("case1", x1, fused, params)

    # case 2: batch not a multiple of 8 -> padded rows excluded from the mean
    x2 = jax.random.normal(jax.random.fold_in(kx, 1), (12, input_dim), jnp.float32)
    check("case2", x2, fused_nz, params_nz)

    # case 3: multi-tile grid -> parallel batch tiles, streamed [A|V], epilogue pass
    x3 = jax.random.normal(jax.random.fold_in(kx, 2), (48, input_dim), jnp.float32)
    check("case3", x3, fused_nz, params_nz, tb_max=16)

    # case 4: multi-tile AND ragged batch -> row masking inside the streamed pass
    x4 = jax.random.normal(jax.random.fold_in(kx, 3), (43, input_dim), jnp.float32)
    check("case4", x4, fused_nz, params_nz, tb_max=16)

    print("KERNEL_OK")
</pallas_src>

<mosaic_0001>
module attributes {stable_mosaic.version = 11 : i64} {
  func.func @_va_single_tile_kernel(%arg0: i32, %arg1: memref<8x16xf32, #tpu.memory_space<vmem>>, %arg2: memref<16x32xf32, #tpu.memory_space<vmem>>, %arg3: memref<1x32xf32, #tpu.memory_space<vmem>>, %arg4: memref<32x32xf32, #tpu.memory_space<vmem>>, %arg5: memref<1x32xf32, #tpu.memory_space<vmem>>, %arg6: memref<32x5xf32, #tpu.memory_space<vmem>>, %arg7: memref<1x5xf32, #tpu.memory_space<vmem>>, %arg8: memref<8x4xf32, #tpu.memory_space<vmem>>) attributes {dimension_semantics = [#tpu.dimension_semantics<arbitrary>], iteration_bounds = array<i64: 1>, scalar_prefetch = 0 : i64, scratch_operands = 0 : i64, tpu.core_type = #tpu.core_type<tc>, window_params = [{pipeline_mode = #tpu.pipeline_mode<synchronous>, transform_indices = @transform_0, window_bounds = array<i64: 8, 16>}, {pipeline_mode = #tpu.pipeline_mode<synchronous>, transform_indices = @transform_1, window_bounds = array<i64: 16, 32>}, {pipeline_mode = #tpu.pipeline_mode<synchronous>, transform_indices = @transform_2, window_bounds = array<i64: 1, 32>}, {pipeline_mode = #tpu.pipeline_mode<synchronous>, transform_indices = @transform_3, window_bounds = array<i64: 32, 32>}, {pipeline_mode = #tpu.pipeline_mode<synchronous>, transform_indices = @transform_4, window_bounds = array<i64: 1, 32>}, {pipeline_mode = #tpu.pipeline_mode<synchronous>, transform_indices = @transform_5, window_bounds = array<i64: 32, 5>}, {pipeline_mode = #tpu.pipeline_mode<synchronous>, transform_indices = @transform_6, window_bounds = array<i64: 1, 5>}, {pipeline_mode = #tpu.pipeline_mode<synchronous>, transform_indices = @transform_7, window_bounds = array<i64: 8, 4>}]} {
    %c0 = arith.constant 0 : index
    %c0_0 = arith.constant 0 : index
    %0 = vector.load %arg1[%c0, %c0_0] : memref<8x16xf32, #tpu.memory_space<vmem>>, vector<8x16xf32>
    %c0_1 = arith.constant 0 : index
    %c0_2 = arith.constant 0 : index
    %1 = vector.load %arg2[%c0_1, %c0_2] : memref<16x32xf32, #tpu.memory_space<vmem>>, vector<16x32xf32>
    %cst = arith.constant dense<0.000000e+00> : vector<8x32xf32>
    %2 = tpu.matmul %0, %1, %cst {dimension_numbers = #tpu.dot_dimension_numbers<[1], [0], [0], [1], [0, 0, 1, 1], [], []>} : vector<8x16xf32>, vector<16x32xf32>, vector<8x32xf32> -> vector<8x32xf32>
    %c0_3 = arith.constant 0 : index
    %c0_4 = arith.constant 0 : index
    %3 = vector.load %arg3[%c0_3, %c0_4] : memref<1x32xf32, #tpu.memory_space<vmem>>, vector<1x32xf32>
    %4 = vector.broadcast %3 : vector<1x32xf32> to vector<8x32xf32>
    %5 = arith.addf %2, %4 : vector<8x32xf32>
    %cst_5 = arith.constant 0.000000e+00 : f32
    %6 = vector.broadcast %cst_5 : f32 to vector<8x32xf32>
    %7 = arith.maximumf %5, %6 : vector<8x32xf32>
    %c0_6 = arith.constant 0 : index
    %c0_7 = arith.constant 0 : index
    %8 = vector.load %arg4[%c0_6, %c0_7] : memref<32x32xf32, #tpu.memory_space<vmem>>, vector<32x32xf32>
    %cst_8 = arith.constant dense<0.000000e+00> : vector<8x32xf32>
    %9 = tpu.matmul %7, %8, %cst_8 {dimension_numbers = #tpu.dot_dimension_numbers<[1], [0], [0], [1], [0, 0, 1, 1], [], []>} : vector<8x32xf32>, vector<32x32xf32>, vector<8x32xf32> -> vector<8x32xf32>
    %c0_9 = arith.constant 0 : index
    %c0_10 = arith.constant 0 : index
    %10 = vector.load %arg5[%c0_9, %c0_10] : memref<1x32xf32, #tpu.memory_space<vmem>>, vector<1x32xf32>
    %11 = vector.broadcast %10 : vector<1x32xf32> to vector<8x32xf32>
    %12 = arith.addf %9, %11 : vector<8x32xf32>
    %cst_11 = arith.constant 0.000000e+00 : f32
    %13 = vector.broadcast %cst_11 : f32 to vector<8x32xf32>
    %14 = arith.maximumf %12, %13 : vector<8x32xf32>
    %c0_12 = arith.constant 0 : index
    %c0_13 = arith.constant 0 : index
    %15 = vector.load %arg6[%c0_12, %c0_13] : memref<32x5xf32, #tpu.memory_space<vmem>>, vector<32x5xf32>
    %cst_14 = arith.constant dense<0.000000e+00> : vector<8x5xf32>
    %16 = tpu.matmul %14, %15, %cst_14 {dimension_numbers = #tpu.dot_dimension_numbers<[1], [0], [0], [1], [0, 0, 1, 1], [], []>} : vector<8x32xf32>, vector<32x5xf32>, vector<8x5xf32> -> vector<8x5xf32>
    %c0_15 = arith.constant 0 : index
    %c0_16 = arith.constant 0 : index
    %17 = vector.load %arg7[%c0_15, %c0_16] : memref<1x5xf32, #tpu.memory_space<vmem>>, vector<1x5xf32>
    %18 = vector.broadcast %17 : vector<1x5xf32> to vector<8x5xf32>
    %19 = arith.addf %16, %18 : vector<8x5xf32>
    %20 = vector.extract_strided_slice %19 {offsets = [0, 0], sizes = [8, 4], strides = [1, 1]} : vector<8x5xf32> to vector<8x4xf32>
    %21 = vector.extract_strided_slice %19 {offsets = [0, 4], sizes = [8, 1], strides = [1, 1]} : vector<8x5xf32> to vector<8x1xf32>
    %cst_17 = arith.constant dense<0.000000e+00> : vector<8xf32>
    %22 = vector.multi_reduction <add>, %20, %cst_17 [1] : vector<8x4xf32> to vector<8xf32>
    %23 = vector.shape_cast %22 : vector<8xf32> to vector<8x1xf32>
    %cst_18 = arith.constant dense<0.000000e+00> : vector<1xf32>
    %24 = vector.multi_reduction <add>, %23, %cst_18 [0] : vector<8x1xf32> to vector<1xf32>
    %25 = vector.shape_cast %24 : vector<1xf32> to vector<1x1xf32>
    %cst_19 = arith.constant 3.125000e-02 : f32
    %26 = vector.broadcast %cst_19 : f32 to vector<1x1xf32>
    %27 = arith.mulf %25, %26 : vector<1x1xf32>
    %28 = vector.broadcast %27 : vector<1x1xf32> to vector<8x4xf32>
    %29 = arith.subf %20, %28 : vector<8x4xf32>
    %30 = vector.broadcast %21 : vector<8x1xf32> to vector<8x4xf32>
    %31 = arith.addf %30, %29 : vector<8x4xf32>
    %c0_20 = arith.constant 0 : index
    %c0_21 = arith.constant 0 : index
    %32 = vector.load %arg8[%c0_20, %c0_21] : memref<8x4xf32, #tpu.memory_space<vmem>>, vector<8x4xf32>
    tpu.vector_store %arg8[%c0_20, %c0_21], %31 {strides = array<i32>} : memref<8x4xf32, #tpu.memory_space<vmem>>, vector<8x4xf32>,
    return
  }
  func.func @transform_0(%arg0: i32) -> (i32, i32) {
    %c0_i32 = arith.constant 0 : i32
    %c0_i32_0 = arith.constant 0 : i32
    %c0_i32_1 = arith.constant 0 : i32
    return %c0_i32, %c0_i32_0 : i32, i32
  }
  func.func @transform_1(%arg0: i32) -> (i32, i32) {
    %c0_i32 = arith.constant 0 : i32
    %c0_i32_0 = arith.constant 0 : i32
    %c0_i32_1 = arith.constant 0 : i32
    return %c0_i32, %c0_i32_0 : i32, i32
  }
  func.func @transform_2(%arg0: i32) -> (i32, i32) {
    %c0_i32 = arith.constant 0 : i32
    %c0_i32_0 = arith.constant 0 : i32
    %c0_i32_1 = arith.constant 0 : i32
    return %c0_i32, %c0_i32_0 : i32, i32
  }
  func.func @transform_3(%arg0: i32) -> (i32, i32) {
    %c0_i32 = arith.constant 0 : i32
    %c0_i32_0 = arith.constant 0 : i32
    %c0_i32_1 = arith.constant 0 : i32
    return %c0_i32, %c0_i32_0 : i32, i32
  }
  func.func @transform_4(%arg0: i32) -> (i32, i32) {
    %c0_i32 = arith.constant 0 : i32
    %c0_i32_0 = arith.constant 0 : i32
    %c0_i32_1 = arith.constant 0 : i32
    return %c0_i32, %c0_i32_0 : i32, i32
  }
  func.func @transform_5(%arg0: i32) -> (i32, i32) {
    %c0_i32 = arith.constant 0 : i32
    %c0_i32_0 = arith.constant 0 : i32
    %c0_i32_1 = arith.constant 0 : i32
    return %c0_i32, %c0_i32_0 : i32, i32
  }
  func.func @transform_6(%arg0: i32) -> (i32, i32) {
    %c0_i32 = arith.constant 0 : i32
    %c0_i32_0 = arith.constant 0 : i32
    %c0_i32_1 = arith.constant 0 : i32
    return %c0_i32, %c0_i32_0 : i32, i32
  }
  func.func @transform_7(%arg0: i32) -> (i32, i32) {
    %c0_i32 = arith.constant 0 : i32
    %c0_i32_0 = arith.constant 0 : i32
    %c0_i32_1 = arith.constant 0 : i32
    return %c0_i32, %c0_i32_0 : i32, i32
  }
}

</mosaic_0001>

<bundles_post_ra>
// kernel: tpu_custom_call.1
= control target key start
LH: loop header
LB: loop body
LE: loop exit
PB: predicated region body
PF: predicated region fallthrough
CT: control target
= control target key end

     0   :  { %12 = vsyncpa [#allocation3], 0  ;;  %s199_s27 = smov [#allocation2]   ;;  %s200_s29 = smov 128   ;;  %s287_s0 = inlined_call_operand.vmem [shape: f32[8,16], index: 0, kind: input, shape index: {}]   ;;  %s288_s1 = inlined_call_operand.hbm [shape: f32[16,32], index: 1, kind: input, shape index: {}]   ;;  %s289_s2 = inlined_call_operand.vmem [shape: f32[1,32], index: 2, kind: input, shape index: {}]   ;;  %s290_s3 = inlined_call_operand.vmem [shape: f32[32,32], index: 3, kind: input, shape index: {}]   ;;  %s291_s4 = inlined_call_operand.vmem [shape: f32[1,32], index: 4, kind: input, shape index: {}]   ;;  %s292_s5 = inlined_call_operand.vmem [shape: f32[32,5], index: 5, kind: input, shape index: {}]   ;;  %s293_s6 = inlined_call_operand.vmem [shape: f32[1,5], index: 6, kind: input, shape index: {}]   ;;  %s294_s7 = inlined_call_operand.vmem [shape: f32[8,4], index: 7, kind: output, shape index: {}]  }
   0x1   :  { %s19_s26 = sshll.u32 %s288_s1, 4  ;;  %s21_s28 = sshll.u32 %s199_s27, 4  ;;  %s20_s26 = int_to_ptr.hbm [resolvable:$true] %s19_s26  ;;  %s22_s28 = int_to_ptr.vmem [resolvable:$true] %s21_s28 }
   0x2   :  { %s201_s30 = smov 8  }
   0x3   :  { %27 = dma.hbm_to_vmem [thread:$0]  %s20_s26, 256, %s22_s28, [#allocation3], %s200_s29, %s200_s29, %s201_s30  }
   0x4   :  { %197 = dma.done.wait [#allocation3], 256  }
   0x5   :  { %198 = vsyncadd [#allocation3], 4294967040  ;;  %v44_v0 = vld [vmem:[#allocation2 + $0x8] sm:$0xff]  ;;  %v43_v1 = vld [vmem:[#allocation2] sm:$0xff]  ;;  %vm49_vm0 = vcmask 130048   ;;  %vm82_vm1 = vcmask 261120  }
   0x6   :  { %67 = vmatpush.msra.mxu0 %v44_v0  ;;  %v42_v2 = vld [vmem:[%s287_s0] sm:$0xff]  ;;  %v77_v3 = vld [vmem:[%s290_s3 + $0x18] sm:$0xff]  ;;  %v76_v4 = vld [vmem:[%s290_s3 + $0x10] sm:$0xff]  ;;  %v202_v19 = vmov 4   ;;  %vm138_vm2 = vcmask 31744  }
   0x7   :  { %98 = vmatpush.msra.mxu1 %v77_v3  ;;  %v75_v5 = vld [vmem:[%s290_s3 + $0x8] sm:$0xff]  ;;  %v74_v6 = vld [vmem:[%s290_s3] sm:$0xff]  ;;  %v110_v7 = vld [vmem:[%s292_s5 + $0x18] sm:$0xff]  ;;  %169 = vset.pattern.permute.xlu0 %v202_v19 }
   0x8   :  { %68 = vmatpush.msra.mxu0 %v43_v1  ;;  %130 = vmatpush.msra.mxu2 %v110_v7  ;;  %v170_v8 = vld [vmem:[%s289_s2] ss:$0 sm:$0xff]  ;;  %v109_v12 = vld [vmem:[%s292_s5 + $0x10] sm:$0xff]  ;;  %v108_v13 = vld [vmem:[%s292_s5 + $0x8] sm:$0xff] }
   0x9   :  { %162 = vmatmul.msk.f32.vlgmr.msra.gmra.mxu0 %vm49_vm0, %v42_v2  ;;  %99 = vmatpush.msra.mxu1 %v76_v4  ;;  %v107_v14 = vld [vmem:[%s292_s5] sm:$0xff] }
   0xa   :  { %131 = vmatpush.msra.mxu2 %v109_v12  ;;  %v171_v15 = vld [vmem:[%s291_s4] ss:$0 sm:$0xff] }
   0xb   :  { %100 = vmatpush.msra.mxu1 %v75_v5  ;;  %v172_v20 = vld [vmem:[%s293_s6] ss:$0 sm:$0xff] }
   0xc   :  { %132 = vmatpush.msra.mxu2 %v108_v13 }
   0xd   :  { %101 = vmatpush.msra.mxu1 %v74_v6 }
   0xe   :  { %133 = vmatpush.msra.mxu2 %v107_v14 }
  0x86   :  { %v70_v9 = vpop.f32.mrf.mxu0 }
  0x87   :  { %v71_v10 = vadd.f32 %v170_v8, %v70_v9 }
  0x89   :  { %v73_v11 = vmax.f32 %v71_v10, 0.0 }
  0x8b   :  { %163 = vmatmul.msk.f32.vlgmr.msra.gmra.mxu1 %vm82_vm1, %v73_v11 }
 0x108   :  { %v103_v16 = vpop.f32.mrf.mxu1 }
 0x109   :  { %v104_v17 = vadd.f32 %v171_v15, %v103_v16 }
 0x10b   :  { %v106_v18 = vmax.f32 %v104_v17, 0.0 }
 0x10d   :  { %164 = vmatmul.msk.f32.vlgmr.msra.gmra.mxu2 %vm82_vm1, %v106_v18 }
 0x190   :  { %v135_v21 = vpop.f32.mrf.mxu2 }
 0x191   :  { %v136_v22 = vadd.f32 %v172_v20, %v135_v21 }
 0x193   :  { %v139_v23 = vsel %vm138_vm2, %v136_v22, 0.0 }
 0x194   :  { %140 = vadd.xlane.f32.xlu0 %v139_v23 }
 0x1a8   :  { %152 = vperm.xlu0 %169, %v136_v22  }
 0x207   :  { %v141_v24 = vpop.xlane.xlu0 %140 }
 0x208   :  { %v142_v25 = vrot.slane %v141_v24, 4 }
 0x20a   :  { %v143_v26 = vadd.f32 %v142_v25, %v141_v24 }
 0x20c   :  { %v144_v27 = vrot.slane %v143_v26, 2 }
 0x20e   :  { %v145_v28 = vadd.f32 %v144_v27, %v143_v26 }
 0x210   :  { %v146_v29 = vrot.slane %v145_v28, 1 }
 0x212   :  { %v147_v30 = vadd.f32 %v146_v29, %v145_v28 }
 0x214   :  { %v148_v31 = vmul.f32 0.03125, %v147_v30 }
 0x216   :  { %v149_v32 = vsub.f32 %v136_v22, %v148_v31 }
 0x21a   :  { %v153_v33 = vpop.permute.xlu0 %152 }
 0x21b   :  { %v155_v34 = vadd.f32 %v153_v33, %v149_v32 }
 0x21d   :  { %156 = vst.msk [vmem:[%s294_s7] sm:$0xff] %vm138_vm2, %v155_v34 }
 0x21e   :  { %161 = vsyncpa [#allocation3], 1 }

</bundles_post_ra>
